<compile_context>
chip_gen: v6e
topology: v6e:2x2x1
jax: 0.10.0
libtpu: 0.0.40
codegen_flags: <defaults>
</compile_context>

<pallas_src>
import functools

import jax
import jax.numpy as jnp
from jax import lax
from jax.experimental import pallas as pl
from jax.experimental.pallas import tpu as pltpu


def _ls_ce_kernel(preds_ref, partial_ref, *, n_rows, n_cls, tile_n, c_chunk):
    pid = pl.program_id(0)

    # Mask for padded tail rows (last tile when N % tile_n != 0).
    row_ids = pid * tile_n + lax.broadcasted_iota(jnp.int32, (tile_n, 1), 0)
    valid = row_ids < n_rows                                       # (T, 1) bool

    if c_chunk >= n_cls:
        # Single-pass path (small / moderate C).
        x = preds_ref[...].astype(jnp.float32)                     # (T, C) f32
        m = jnp.max(x, axis=-1, keepdims=True)                     # (T, 1)
        s = jnp.sum(jnp.exp(x - m), axis=-1, keepdims=True)        # (T, 1)
        row_sum = jnp.sum(x, axis=-1, keepdims=True)               # (T, 1)
    else:
        # Online logsumexp over static class chunks: f32 temporaries bounded to
        # (tile_n, c_chunk) so row tiles stay large for vocab-scale C.
        m = jnp.full((tile_n, 1), -jnp.inf, dtype=jnp.float32)
        s = jnp.zeros((tile_n, 1), dtype=jnp.float32)
        row_sum = jnp.zeros((tile_n, 1), dtype=jnp.float32)
        for start in range(0, n_cls, c_chunk):                     # static unroll
            width = min(c_chunk, n_cls - start)
            xc = preds_ref[:, start:start + width].astype(jnp.float32)
            m_new = jnp.maximum(m, jnp.max(xc, axis=-1, keepdims=True))
            s = s * jnp.exp(m - m_new) + jnp.sum(
                jnp.exp(xc - m_new), axis=-1, keepdims=True)
            row_sum = row_sum + jnp.sum(xc, axis=-1, keepdims=True)
            m = m_new

    lse = m + jnp.log(s)                                           # (T, 1)

    # Smoothing term: -sum_c log_softmax = C*lse - sum_c x.
    smooth_i = n_cls * lse - row_sum
    # NaN/Inf from OOB tail rows must be dropped via select (not mask-multiply).
    smooth_i = jnp.where(valid, smooth_i, 0.0)
    lse_i = jnp.where(valid, lse, 0.0)

    smooth_sum = jnp.sum(smooth_i, axis=0, keepdims=True)          # (1, 1)
    lse_sum = jnp.sum(lse_i, axis=0, keepdims=True)                # (1, 1)

    # Lane-dense partial slab: sublane 0 = smoothing partial, 1 = lse partial.
    sub_ids = lax.broadcasted_iota(jnp.int32, (8, 128), 0)
    slab = jnp.where(sub_ids == 0, smooth_sum,
                     jnp.where(sub_ids == 1, lse_sum, 0.0))
    partial_ref[0, :, :] = slab


def label_smoothing_cross_entropy(preds, target, epsilon: float = 0.1,
                                  reduction: str = "mean",
                                  tile_n: int | None = None,
                                  c_chunk: int | None = None):
    """preds: (N, C) float (f32/bf16), target: (N,) int in [0, C). Scalar f32."""
    if reduction not in ("mean", "sum"):
        # TODO(synk): reduction='none' needs a per-row output block; not implemented.
        raise NotImplementedError("only reduction='mean' or 'sum' is implemented")

    n_rows, n_cls = preds.shape
    in_bytes = preds.dtype.itemsize

    # Class chunking for vocab-scale C (bounds in-kernel f32 temporaries).
    if c_chunk is None:
        c_chunk = 2048 if n_cls > 4096 else n_cls
    c_chunk = min(c_chunk, n_cls)

    # Generation-aware VMEM budget (v7x: 64 MiB/TC vs 128 MiB on v5e/v6e).
    try:
        vmem_cap = int(pltpu.get_tpu_info().vmem_capacity_bytes)
    except Exception:
        vmem_cap = 64 * 1024 * 1024                 # conservative fallback (v7x)
    small_vmem = vmem_cap <= 64 * 1024 * 1024
    vmem_limit = (32 if small_vmem else 48) * 1024 * 1024

    if tile_n is None:
        budget = vmem_limit // 2                    # headroom for pipeline slack
        # Per-row VMEM cost: double-buffered native-dtype input tile plus ~4
        # f32 working buffers over the active class span (cast copy, exp, sums).
        per_row_bytes = 2 * n_cls * in_bytes + 4 * 4 * c_chunk
        tile_n = max(8, min(1024, (budget // max(1, per_row_bytes)) // 8 * 8))
        if tile_n >= n_rows:
            if n_rows >= 16:
                # Ensure >= 2 tiles so the "parallel" axis feeds both v7x TCs.
                tile_n = ((pl.cdiv(n_rows, 2) + 7) // 8) * 8
            else:
                tile_n = n_rows                     # full dim -> always legal
    if tile_n >= n_rows:
        tile_n = n_rows
    num_tiles = pl.cdiv(n_rows, tile_n)

    kernel = functools.partial(_ls_ce_kernel, n_rows=n_rows, n_cls=n_cls,
                               tile_n=tile_n, c_chunk=c_chunk)

    cost = pl.CostEstimate(
        flops=5 * n_rows * n_cls,                   # ~4-5 VALU ops/elem post-hoist
        transcendentals=n_rows * n_cls,
        bytes_accessed=n_rows * n_cls * in_bytes + num_tiles * 8 * 128 * 4,
    )

    partials = pl.pallas_call(
        kernel,
        out_shape=jax.ShapeDtypeStruct((num_tiles, 8, 128), jnp.float32),
        grid=(num_tiles,),
        in_specs=[pl.BlockSpec((tile_n, n_cls), lambda i: (i, 0))],
        out_specs=pl.BlockSpec((1, 8, 128), lambda i: (i, 0, 0)),
        compiler_params=pltpu.CompilerParams(
            dimension_semantics=("parallel",),
            vmem_limit_bytes=vmem_limit,
        ),
        cost_estimate=cost,
    )(preds)

    smooth_total = jnp.sum(partials[:, 0, 0])
    lse_total = jnp.sum(partials[:, 1, 0])

    # Target gather hoisted out of the kernel: tiny O(N) HBM side-read.
    # Targets assumed in [0, C); no ignore_index handling (matches the module).
    x_tgt = jnp.take_along_axis(preds, target.astype(jnp.int32)[:, None], axis=-1)
    nll_total = lse_total - jnp.sum(x_tgt.astype(jnp.float32))

    denom = jnp.float32(n_rows if reduction == "mean" else 1)
    loss = smooth_total / denom
    nll = nll_total / denom
    return epsilon * (loss / n_cls) + (1.0 - epsilon) * nll


def _reference(preds, target, epsilon=0.1, reduction="mean"):
    log_preds = jax.nn.log_softmax(preds.astype(jnp.float32), axis=-1)
    n = preds.shape[-1]
    red = jnp.mean if reduction == "mean" else jnp.sum
    loss = red(-jnp.sum(log_preds, axis=-1))
    nll = red(-jnp.take_along_axis(log_preds, target[:, None], axis=-1)[:, 0])
    return epsilon * (loss / n) + (1 - epsilon) * nll


if __name__ == "__main__":
    key = jax.random.PRNGKey(0)
    ks = jax.random.split(key, 8)

    def check(preds, target, **kw):
        out = jax.block_until_ready(label_smoothing_cross_entropy(preds, target, **kw))
        ref = _reference(preds, target, epsilon=kw.get("epsilon", 0.1),
                         reduction=kw.get("reduction", "mean"))
        assert jnp.allclose(out, ref, atol=1e-4, rtol=1e-4), (out, ref)

    # Case 1: small, single tile.
    p1 = jax.random.normal(ks[0], (8, 32), dtype=jnp.float32)
    t1 = jax.random.randint(ks[1], (8,), 0, 32, dtype=jnp.int32)
    check(p1, t1)

    # Case 2: multi-tile grid with a masked tail (N=20, tile_n=8 -> 3 tiles).
    p2 = jax.random.normal(ks[2], (20, 40), dtype=jnp.float32)
    t2 = jax.random.randint(ks[3], (20,), 0, 40, dtype=jnp.int32)
    check(p2, t2, tile_n=8)

    # Case 3: class-chunked online-logsumexp path (c_chunk=128, remainder=32),
    # auto row tiling (2 tiles, second one partially masked).
    p3 = jax.random.normal(ks[4], (24, 160), dtype=jnp.float32)
    t3 = jax.random.randint(ks[5], (24,), 0, 160, dtype=jnp.int32)
    check(p3, t3, c_chunk=128)

    # Case 4: bf16 inputs, reduction='sum', auto tiling (2 row tiles).
    p4 = jax.random.normal(ks[6], (16, 64), dtype=jnp.bfloat16)
    t4 = jax.random.randint(ks[7], (16,), 0, 64, dtype=jnp.int32)
    check(p4, t4, reduction="sum")

    print("KERNEL_OK")
</pallas_src>

<mosaic_0001>
module attributes {stable_mosaic.version = 11 : i64} {
  func.func @_ls_ce_kernel(%arg0: i32, %arg1: memref<8x32xf32, #tpu.memory_space<vmem>>, %arg2: memref<1x8x128xf32, #tpu.memory_space<vmem>>) attributes {dimension_semantics = [#tpu.dimension_semantics<parallel>], iteration_bounds = array<i64: 1>, scalar_prefetch = 0 : i64, scratch_operands = 0 : i64, tpu.core_type = #tpu.core_type<tc>, window_params = [{transform_indices = @transform_0, window_bounds = array<i64: 8, 32>}, {transform_indices = @transform_1, window_bounds = array<i64: 1, 8, 128>}]} {
    %c8_i32 = arith.constant 8 : i32
    %0 = arith.muli %arg0, %c8_i32 : i32
    %1 = tpu.iota {dimensions = array<i32: 0>} : vector<8x1xi32>
    %2 = vector.broadcast %0 : i32 to vector<8x1xi32>
    %3 = arith.addi %2, %1 : vector<8x1xi32>
    %c8_i32_0 = arith.constant 8 : i32
    %4 = vector.broadcast %c8_i32_0 : i32 to vector<8x1xi32>
    %5 = arith.cmpi slt, %3, %4 : vector<8x1xi32>
    %c0 = arith.constant 0 : index
    %c0_1 = arith.constant 0 : index
    %6 = vector.load %arg1[%c0, %c0_1] : memref<8x32xf32, #tpu.memory_space<vmem>>, vector<8x32xf32>
    %cst = arith.constant dense<0xFF800000> : vector<8xf32>
    %7 = vector.multi_reduction <maximumf>, %6, %cst [1] : vector<8x32xf32> to vector<8xf32>
    %8 = vector.shape_cast %7 : vector<8xf32> to vector<8x1xf32>
    %9 = vector.broadcast %8 : vector<8x1xf32> to vector<8x32xf32>
    %10 = arith.subf %6, %9 : vector<8x32xf32>
    %11 = math.exp %10 : vector<8x32xf32>
    %cst_2 = arith.constant dense<0.000000e+00> : vector<8xf32>
    %12 = vector.multi_reduction <add>, %11, %cst_2 [1] : vector<8x32xf32> to vector<8xf32>
    %13 = vector.shape_cast %12 : vector<8xf32> to vector<8x1xf32>
    %cst_3 = arith.constant dense<0.000000e+00> : vector<8xf32>
    %14 = vector.multi_reduction <add>, %6, %cst_3 [1] : vector<8x32xf32> to vector<8xf32>
    %15 = vector.shape_cast %14 : vector<8xf32> to vector<8x1xf32>
    %16 = math.log %13 : vector<8x1xf32>
    %17 = arith.addf %8, %16 : vector<8x1xf32>
    %cst_4 = arith.constant 3.200000e+01 : f32
    %18 = vector.broadcast %cst_4 : f32 to vector<8x1xf32>
    %19 = arith.mulf %18, %17 : vector<8x1xf32>
    %20 = arith.subf %19, %15 : vector<8x1xf32>
    %cst_5 = arith.constant 0.000000e+00 : f32
    %21 = vector.broadcast %cst_5 : f32 to vector<8x1xf32>
    %22 = arith.select %5, %20, %21 : vector<8x1xi1>, vector<8x1xf32>
    %cst_6 = arith.constant 0.000000e+00 : f32
    %23 = vector.broadcast %cst_6 : f32 to vector<8x1xf32>
    %24 = arith.select %5, %17, %23 : vector<8x1xi1>, vector<8x1xf32>
    %cst_7 = arith.constant dense<0.000000e+00> : vector<1xf32>
    %25 = vector.multi_reduction <add>, %22, %cst_7 [0] : vector<8x1xf32> to vector<1xf32>
    %26 = vector.shape_cast %25 : vector<1xf32> to vector<1x1xf32>
    %cst_8 = arith.constant dense<0.000000e+00> : vector<1xf32>
    %27 = vector.multi_reduction <add>, %24, %cst_8 [0] : vector<8x1xf32> to vector<1xf32>
    %28 = vector.shape_cast %27 : vector<1xf32> to vector<1x1xf32>
    %29 = tpu.iota {dimensions = array<i32: 0>} : vector<8x128xi32>
    %c0_i32 = arith.constant 0 : i32
    %30 = vector.broadcast %c0_i32 : i32 to vector<8x128xi32>
    %31 = arith.cmpi eq, %29, %30 : vector<8x128xi32>
    %c1_i32 = arith.constant 1 : i32
    %32 = vector.broadcast %c1_i32 : i32 to vector<8x128xi32>
    %33 = arith.cmpi eq, %29, %32 : vector<8x128xi32>
    %cst_9 = arith.constant 0.000000e+00 : f32
    %34 = vector.shape_cast %28 : vector<1x1xf32> to vector<1x1xf32>
    %35 = vector.broadcast %34 : vector<1x1xf32> to vector<8x128xf32>
    %36 = vector.broadcast %cst_9 : f32 to vector<8x128xf32>
    %37 = arith.select %33, %35, %36 : vector<8x128xi1>, vector<8x128xf32>
    %38 = vector.shape_cast %26 : vector<1x1xf32> to vector<1x1xf32>
    %39 = vector.broadcast %38 : vector<1x1xf32> to vector<8x128xf32>
    %40 = arith.select %31, %39, %37 : vector<8x128xi1>, vector<8x128xf32>
    %c0_10 = arith.constant 0 : index
    %c0_11 = arith.constant 0 : index
    %c0_12 = arith.constant 0 : index
    %41 = vector.load %arg2[%c0_10, %c0_11, %c0_12] : memref<1x8x128xf32, #tpu.memory_space<vmem>>, vector<1x8x128xf32>
    %42 = vector.shape_cast %41 : vector<1x8x128xf32> to vector<8x128xf32>
    %43 = vector.shape_cast %40 : vector<8x128xf32> to vector<1x8x128xf32>
    tpu.vector_store %arg2[%c0_10, %c0_11, %c0_12], %43 {strides = array<i32>} : memref<1x8x128xf32, #tpu.memory_space<vmem>>, vector<1x8x128xf32>,
    return
  }
  func.func @transform_0(%arg0: i32) -> (i32, i32) {
    %c0_i32 = arith.constant 0 : i32
    %c0_i32_0 = arith.constant 0 : i32
    return %arg0, %c0_i32 : i32, i32
  }
  func.func @transform_1(%arg0: i32) -> (i32, i32, i32) {
    %c0_i32 = arith.constant 0 : i32
    %c0_i32_0 = arith.constant 0 : i32
    %c0_i32_1 = arith.constant 0 : i32
    return %arg0, %c0_i32, %c0_i32_0 : i32, i32, i32
  }
}

</mosaic_0001>

<bundles_post_ra>
// kernel: tpu_custom_call.1
= control target key start
LH: loop header
LB: loop body
LE: loop exit
PB: predicated region body
PF: predicated region fallthrough
CT: control target
= control target key end

     0   :  { %6 = vsyncpa [#allocation3], 0  ;;  %s148_s0 = inlined_call_operand.hbm [shape: f32[8,32], index: 0, kind: input, shape index: {}]   ;;  %s149_s1 = inlined_call_operand.hbm [shape: f32[1,8,128], index: 1, kind: output, shape index: {}]  }
   0x1   :  { %7 = vsyncpa [#allocation4], 0  ;;  %s130_s6 = smov [#allocation2]  }
   0x2   :  { %s14_s7 = sshll.u32 %s130_s6, 4  ;;  %s15_s7 = int_to_ptr.vmem [resolvable:$true] %s14_s7 }
   0x3   :  { %s94_s8 = scalar_lea.vmem %s15_s7, 128  ;;  %p99_p1 = scmp.lt.s32.totalorder %s15_s7, %s15_s7 }
   0x4   :  { %p95_p0 = scmp.ne.s32.totalorder %s15_s7, %s94_s8  ;;  %p100_p2 = scmp.lt.s32.totalorder %s94_s8, %s94_s8 }
   0x6   :  { %p101_p3 = por %p100_p2, %p99_p1 }
   0x8   :  { %p102_p4 = pnand %p101_p3, %p95_p0 }
   0xa   :  { %105 = shalt.err (!%p102_p4)
}
   0xb   :  { %17 = dma.hbm_to_vmem [thread:$0]  %s148_s0, 128, %s15_s7, [#allocation3]  }
   0xc   :  { %126 = dma.done.wait [#allocation3], 128  }
   0xd   :  { %127 = vsyncadd [#allocation3], 4294967168  ;;  %vm28_vm0 = vcmask 261120   ;;  %v27_v0 = vld [vmem:[#allocation2] sm:$0xff]  ;;  %v22_v18 = vlaneseq  ;;  %s131_s0 = smov [#allocation5]  }
   0xe   :  { %v29_v1 = vsel %vm28_vm0, %v27_v0, -inf  ;;  %v38_v2 = vsel %vm28_vm0, %v27_v0, 0.0  ;;  %s71_s11 = sshll.u32 %s131_s0, 4  ;;  %s72_s11 = int_to_ptr.vmem [resolvable:$true] %s71_s11 }
   0xf   :  { %30 = vmax.xlane.f32.xlu0 %v29_v1  ;;  %39 = vadd.xlane.f32.xlu1 %v38_v2  ;;  %v23_v23 = vshrl.u32 %v22_v18, 7  ;;  %s106_s12 = scalar_lea.vmem %s72_s11, 128  ;;  %p111_p6 = scmp.lt.s32.totalorder %s72_s11, %s72_s11 }
  0x10   :  { %p107_p5 = scmp.ne.s32.totalorder %s72_s11, %s106_s12  ;;  %p112_p7 = scmp.lt.s32.totalorder %s106_s12, %s106_s12 }
  0x11   :  { %vm61_vm1 = vcmp.eq.s32.totalorder %v23_v23, 1  ;;  %vm60_vm2 = vcmp.eq.s32.totalorder %v23_v23, 0 }
  0x12   :  { %p113_p8 = por %p112_p7, %p111_p6 }
  0x14   :  { %p114_p9 = pnand %p113_p8, %p107_p5 }
  0x98   :  { %v31_v3 = vpop.xlane.xlu0 %30  ;;  %v40_v12 = vpop.xlane.xlu1 %39 }
  0x99   :  { %v32_v4 = vsub.f32 %v27_v0, %v31_v3 }
  0x9b   :  { %v33_v5 = vmul.f32 1.442695, %v32_v4 }
  0x9d   :  { %82 = vpow2.f32 %v33_v5 }
  0xaa   :  { %v83_v6 = vpop.eup %82 }
  0xab   :  { %v35_v7 = vsel %vm28_vm0, %v83_v6, 0.0 }
  0xac   :  { %36 = vadd.xlane.f32.xlu0 %v35_v7 }
 0x135   :  { %v37_v8 = vpop.xlane.xlu0 %36 }
 0x136   :  { %84 = vlog2.f32 %v37_v8 }
 0x143   :  { %v85_v9 = vpop.eup %84 }
 0x144   :  { %v42_v10 = vmul.f32 0.6931472, %v85_v9 }
 0x146   :  { %v43_v11 = vadd.f32 %v42_v10, %v31_v3 }
 0x148   :  { %v54_v13 = vrot.slane %v43_v11, 4  ;;  %v44_v14 = vmul.f32 32.0, %v43_v11 }
 0x14a   :  { %v55_v15 = vadd.f32 %v54_v13, %v43_v11  ;;  %v45_v16 = vsub.f32 %v44_v14, %v40_v12 }
 0x14c   :  { %v48_v17 = vrot.slane %v45_v16, 4  ;;  %v56_v19 = vrot.slane %v55_v15, 2 }
 0x14e   :  { %v49_v20 = vadd.f32 %v48_v17, %v45_v16  ;;  %v57_v21 = vadd.f32 %v56_v19, %v55_v15 }
 0x150   :  { %v50_v22 = vrot.slane %v49_v20, 2  ;;  %v58_v24 = vrot.slane %v57_v21, 1 }
 0x152   :  { %v51_v25 = vadd.f32 %v50_v22, %v49_v20  ;;  %v59_v26 = vadd.f32 %v58_v24, %v57_v21 }
 0x154   :  { %v52_v27 = vrot.slane %v51_v25, 1  ;;  %v62_v29 = vsel %vm61_vm1, %v59_v26, 0.0 }
 0x156   :  { %v53_v28 = vadd.f32 %v52_v27, %v51_v25 }
 0x158   :  { %v63_v30 = vsel %vm60_vm2, %v53_v28, %v62_v29 }
 0x159   :  { %64 = vst [vmem:[#allocation5] sm:$0xff] %v63_v30 }
 0x15a   :  { %117 = shalt.err (!%p114_p9)
}
 0x15b   :  { %74 = dma.vmem_to_hbm [thread:$0]  %s72_s11, 128, %s149_s1, [#allocation4]  }
 0x15c   :  { %128 = dma.done.wait [#allocation4], 128  }
 0x15d   :  { %129 = vsyncadd [#allocation4], 4294967168 }
 0x15e   :  { %78 = vsyncpa [#allocation3], 1 }
 0x15f   :  { %79 = vsyncpa [#allocation4], 1 }

</bundles_post_ra>
